<compile_context>
chip_gen: v7x
topology: tpu7x:2x2x1
jax: 0.10.0
libtpu: 0.0.40
codegen_flags: <defaults>
</compile_context>

<pallas_src>
import functools

import jax
import jax.numpy as jnp
from jax.experimental import pallas as pl
from jax.experimental.pallas import tpu as pltpu


def _pointnet_loss_kernel(pred_ref, tgt_ref, trans_ref, out_ref, *,
                          total_b, block_b, inv_b, scale_over_b, mxu_dtype):
    i = pl.program_id(0)

    # Tail mask for the last (possibly partial) block.  total_b / block_b are
    # compile-time constants, so this is a cheap in-kernel compare instead of a
    # wrapper-side pad of the inputs.
    row = jax.lax.broadcasted_iota(jnp.int32, (block_b, 1), 0)
    valid = (i * block_b + row) < total_b                        # (TB, 1) bool

    # ---- feature-transform regularizer:  ||T @ (T^T - I)||_F == ||T@T^T - T||_F
    t = trans_ref[...]                                           # (TB, d, d) native dtype
    t_mm = t if mxu_dtype is None else t.astype(mxu_dtype)       # MXU operands (bf16 if input bf16)
    g = jnp.einsum('bij,bkj->bik', t_mm, t_mm,
                   preferred_element_type=jnp.float32)           # Gram = T @ T^T, f32 accumulate
    diff = g - t.astype(jnp.float32)                             # == T @ (T^T - I)
    per = jnp.sum(diff * diff, axis=-1)                          # (TB, d)  lane reduce
    per = jnp.sum(per, axis=-1, keepdims=True)                   # (TB, 1)
    fro = jnp.where(valid, jnp.sqrt(per), 0.0)                   # mask tail rows (NaN-safe select)
    fro_partial = jnp.sum(fro)

    # ---- NLL numerator: sum_b pred[b, target[b]]  (where-gather, tail masked)
    # Assumes F.nll_loss defaults: no class weights, no ignore_index, mean over B.
    pred = pred_ref[...].astype(jnp.float32)                     # cast AFTER the DMA (in VMEM)
    tgt = tgt_ref[...]                                           # (TB, 1) int32
    cls = jax.lax.broadcasted_iota(jnp.int32, pred.shape, 1)
    picked = jnp.where(valid & (cls == tgt), pred, 0.0)
    picked_partial = jnp.sum(picked)

    # Per-block contribution to the final scalar (loss is linear in the partials).
    contrib = fro_partial * scale_over_b - picked_partial * inv_b
    out_ref[...] = jnp.full(out_ref.shape, contrib, jnp.float32)  # lane-dense (1,8,128) tile


def _choose_block_b(B, d, block_b):
    if block_b is None:
        # ~4 MiB of f32 trans-sized temporaries per block: amortizes the ~0.35 us
        # per-step overhead while keeping the block working set (inputs double-
        # buffered + g/diff temporaries, ~20 MiB) under default scoped VMEM on
        # v6e/v7x; vmem_limit_bytes below covers v5e's 16 MiB default.
        block_b = max(8, (4 * 1024 * 1024) // max(1, d * d * 4))
    tb = min(int(block_b), int(B))
    if tb < B:
        tb = max(8, (tb // 8) * 8)        # sublane-aligned when actually blocking
    return tb


def loss_for_pointnet(pred, target, trans_feat, mat_diff_loss_scale=0.001,
                      block_b=None, mxu_dtype=None):
    """pred: [B, C] log-probs; target: [B] int; trans_feat: [B, d, d].

    block_b: override samples-per-block (e.g. to get >=2 blocks for v7x 2-TC
             sharding when the batch is large enough to be compute-bound).
    mxu_dtype: optionally force the Gram-matmul operand dtype (e.g. jnp.bfloat16
             for f32 inputs on v6e/v7x); accumulation is always f32.
    """
    B, C = pred.shape
    _, d, _ = trans_feat.shape

    TB = _choose_block_b(B, d, block_b)
    nb = -(-B // TB)

    # No pad, no upcast: inputs are handed to the kernel as-is; only the tiny
    # target vector is reshaped to a column so it can be compared with a class iota.
    tgt2d = target.astype(jnp.int32).reshape(B, 1)

    kernel = functools.partial(
        _pointnet_loss_kernel,
        total_b=B, block_b=TB,
        inv_b=1.0 / B,
        scale_over_b=float(mat_diff_loss_scale) / B,
        mxu_dtype=mxu_dtype)

    partials = pl.pallas_call(
        kernel,
        out_shape=jax.ShapeDtypeStruct((nb, 8, 128), jnp.float32),
        grid_spec=pltpu.PrefetchScalarGridSpec(
            num_scalar_prefetch=0,
            grid=(nb,),
            in_specs=[
                pl.BlockSpec((TB, C), lambda i: (i, 0)),         # pred block (native dtype)
                pl.BlockSpec((TB, 1), lambda i: (i, 0)),         # target column block
                pl.BlockSpec((TB, d, d), lambda i: (i, 0, 0)),   # trans_feat block (native dtype)
            ],
            out_specs=pl.BlockSpec((1, 8, 128), lambda i: (i, 0, 0)),
        ),
        compiler_params=pltpu.CompilerParams(
            dimension_semantics=("parallel",),                   # blocks independent (v7x 2-TC if nb>=2)
            vmem_limit_bytes=48 * 1024 * 1024),
    )(pred, tgt2d, trans_feat)

    # Single slice + reduce (nb == 1 for typical PointNet batch sizes).
    return jnp.sum(partials[:, 0, 0])


def _reference(pred, target, trans_feat, scale=0.001):
    pred = pred.astype(jnp.float32)
    trans = trans_feat.astype(jnp.float32)
    B = pred.shape[0]
    d = trans.shape[1]
    nll = -jnp.mean(pred[jnp.arange(B), target])
    eye = jnp.eye(d, dtype=jnp.float32)[None]
    m = jnp.matmul(trans, jnp.swapaxes(trans, 1, 2) - eye,
                   precision=jax.lax.Precision.HIGHEST)
    fro = jnp.sqrt(jnp.sum(m * m, axis=(1, 2)))
    return nll + jnp.mean(fro) * scale


if __name__ == "__main__":
    key = jax.random.PRNGKey(0)
    k1, k2, k3, k4, k5, k6 = jax.random.split(key, 6)

    # 1) Small f32 run: whole batch in a single block.
    B, C, d = 4, 8, 16
    pred = jax.nn.log_softmax(jax.random.normal(k1, (B, C), dtype=jnp.float32), axis=-1)
    target = jax.random.randint(k2, (B,), 0, C, dtype=jnp.int32)
    trans = 0.1 * jax.random.normal(k3, (B, d, d), dtype=jnp.float32)

    loss = jax.block_until_ready(loss_for_pointnet(pred, target, trans))
    ref = _reference(pred, target, trans)
    assert jnp.allclose(loss, ref, rtol=1e-5, atol=1e-5), (loss, ref)

    # 2) Multi-block path with an unpadded tail (B % TB != 0 -> in-kernel mask).
    B2, C2, d2 = 20, 16, 32
    pred2 = jax.nn.log_softmax(jax.random.normal(k4, (B2, C2), dtype=jnp.float32), axis=-1)
    target2 = jax.random.randint(k5, (B2,), 0, C2, dtype=jnp.int32)
    trans2 = 0.1 * jax.random.normal(k6, (B2, d2, d2), dtype=jnp.float32)

    loss2 = jax.block_until_ready(loss_for_pointnet(pred2, target2, trans2, block_b=8))
    ref2 = _reference(pred2, target2, trans2)
    assert jnp.allclose(loss2, ref2, rtol=1e-5, atol=1e-5), (loss2, ref2)

    # 3) bf16 inputs: no wrapper upcast; MXU sees native bf16 operands, f32 accum.
    pred3 = pred2.astype(jnp.bfloat16)
    trans3 = trans2.astype(jnp.bfloat16)
    loss3 = jax.block_until_ready(loss_for_pointnet(pred3, target2, trans3))
    ref3 = _reference(pred3, target2, trans3)
    assert jnp.allclose(loss3, ref3, rtol=1e-4, atol=1e-4), (loss3, ref3)

    print("KERNEL_OK")
</pallas_src>

<mosaic_0001>
module attributes {stable_mosaic.version = 11 : i64} {
  func.func @_pointnet_loss_kernel(%arg0: i32, %arg1: memref<4x8xf32, #tpu.memory_space<vmem>>, %arg2: memref<4x1xi32, #tpu.memory_space<vmem>>, %arg3: memref<4x16x16xf32, #tpu.memory_space<vmem>>, %arg4: memref<1x8x128xf32, #tpu.memory_space<vmem>>) attributes {dimension_semantics = [#tpu.dimension_semantics<parallel>], iteration_bounds = array<i64: 1>, scalar_prefetch = 0 : i64, scratch_operands = 0 : i64, tpu.core_type = #tpu.core_type<tc>, window_params = [{transform_indices = @transform_0, window_bounds = array<i64: 4, 8>}, {transform_indices = @transform_1, window_bounds = array<i64: 4, 1>}, {transform_indices = @transform_2, window_bounds = array<i64: 4, 16, 16>}, {transform_indices = @transform_3, window_bounds = array<i64: 1, 8, 128>}]} {
    %0 = tpu.iota {dimensions = array<i32: 0>} : vector<4x1xi32>
    %c4_i32 = arith.constant 4 : i32
    %1 = arith.muli %arg0, %c4_i32 : i32
    %2 = vector.broadcast %1 : i32 to vector<4x1xi32>
    %3 = arith.addi %2, %0 : vector<4x1xi32>
    %c4_i32_0 = arith.constant 4 : i32
    %4 = vector.broadcast %c4_i32_0 : i32 to vector<4x1xi32>
    %5 = arith.cmpi slt, %3, %4 : vector<4x1xi32>
    %c0 = arith.constant 0 : index
    %c0_1 = arith.constant 0 : index
    %c0_2 = arith.constant 0 : index
    %6 = vector.load %arg3[%c0, %c0_1, %c0_2] : memref<4x16x16xf32, #tpu.memory_space<vmem>>, vector<4x16x16xf32>
    "tpu.trace_start"() <{level = 10 : i32, message = "bij,bkj->bik"}> : () -> ()
    %cst = arith.constant dense<0.000000e+00> : vector<4x16x16xf32>
    %7 = tpu.matmul %6, %6, %cst {dimension_numbers = #tpu.dot_dimension_numbers<[2], [2], [1], [1], [0, 0, 0, 1, 1, 1], [0], [0]>} : vector<4x16x16xf32>, vector<4x16x16xf32>, vector<4x16x16xf32> -> vector<4x16x16xf32>
    "tpu.trace_stop"() : () -> ()
    %8 = arith.subf %7, %6 : vector<4x16x16xf32>
    %9 = arith.mulf %8, %8 : vector<4x16x16xf32>
    %cst_3 = arith.constant dense<0.000000e+00> : vector<4x16xf32>
    %10 = vector.multi_reduction <add>, %9, %cst_3 [2] : vector<4x16x16xf32> to vector<4x16xf32>
    %cst_4 = arith.constant dense<0.000000e+00> : vector<4xf32>
    %11 = vector.multi_reduction <add>, %10, %cst_4 [1] : vector<4x16xf32> to vector<4xf32>
    %12 = vector.shape_cast %11 : vector<4xf32> to vector<4x1xf32>
    %13 = math.sqrt %12 : vector<4x1xf32>
    %cst_5 = arith.constant 0.000000e+00 : f32
    %14 = vector.broadcast %cst_5 : f32 to vector<4x1xf32>
    %15 = arith.select %5, %13, %14 : vector<4x1xi1>, vector<4x1xf32>
    %16 = vector.shape_cast %15 : vector<4x1xf32> to vector<1x4x1xf32>
    %cst_6 = arith.constant dense<0.000000e+00> : vector<1xf32>
    %17 = vector.multi_reduction <add>, %16, %cst_6 [1, 2] : vector<1x4x1xf32> to vector<1xf32>
    %18 = vector.shape_cast %17 : vector<1xf32> to vector<1x1x1xf32>
    %19 = vector.extract %18[0, 0, 0] : f32 from vector<1x1x1xf32>
    %c0_7 = arith.constant 0 : index
    %c0_8 = arith.constant 0 : index
    %20 = vector.load %arg1[%c0_7, %c0_8] : memref<4x8xf32, #tpu.memory_space<vmem>>, vector<4x8xf32>
    %c0_9 = arith.constant 0 : index
    %c0_10 = arith.constant 0 : index
    %21 = vector.load %arg2[%c0_9, %c0_10] : memref<4x1xi32, #tpu.memory_space<vmem>>, vector<4x1xi32>
    %22 = tpu.iota {dimensions = array<i32: 1>} : vector<4x8xi32>
    %23 = vector.broadcast %21 : vector<4x1xi32> to vector<4x8xi32>
    %24 = arith.cmpi eq, %22, %23 : vector<4x8xi32>
    %25 = vector.broadcast %5 : vector<4x1xi1> to vector<4x8xi1>
    %26 = arith.andi %25, %24 : vector<4x8xi1>
    %cst_11 = arith.constant 0.000000e+00 : f32
    %27 = vector.broadcast %cst_11 : f32 to vector<4x8xf32>
    %28 = arith.select %26, %20, %27 : vector<4x8xi1>, vector<4x8xf32>
    %29 = vector.shape_cast %28 : vector<4x8xf32> to vector<1x4x8xf32>
    %cst_12 = arith.constant dense<0.000000e+00> : vector<1xf32>
    %30 = vector.multi_reduction <add>, %29, %cst_12 [1, 2] : vector<1x4x8xf32> to vector<1xf32>
    %31 = vector.shape_cast %30 : vector<1xf32> to vector<1x1x1xf32>
    %32 = vector.extract %31[0, 0, 0] : f32 from vector<1x1x1xf32>
    %cst_13 = arith.constant 2.500000e-04 : f32
    %33 = arith.mulf %19, %cst_13 : f32
    %cst_14 = arith.constant 2.500000e-01 : f32
    %34 = arith.mulf %32, %cst_14 : f32
    %35 = arith.subf %33, %34 : f32
    %36 = vector.broadcast %35 : f32 to vector<1x8x128xf32>
    %c0_15 = arith.constant 0 : index
    %c0_16 = arith.constant 0 : index
    %c0_17 = arith.constant 0 : index
    %37 = vector.load %arg4[%c0_15, %c0_16, %c0_17] : memref<1x8x128xf32, #tpu.memory_space<vmem>>, vector<1x8x128xf32>
    tpu.vector_store %arg4[%c0_15, %c0_16, %c0_17], %36 {strides = array<i32>} : memref<1x8x128xf32, #tpu.memory_space<vmem>>, vector<1x8x128xf32>,
    return
  }
  func.func @transform_0(%arg0: i32) -> (i32, i32) {
    %c0_i32 = arith.constant 0 : i32
    %c0_i32_0 = arith.constant 0 : i32
    return %arg0, %c0_i32 : i32, i32
  }
  func.func @transform_1(%arg0: i32) -> (i32, i32) {
    %c0_i32 = arith.constant 0 : i32
    %c0_i32_0 = arith.constant 0 : i32
    return %arg0, %c0_i32 : i32, i32
  }
  func.func @transform_2(%arg0: i32) -> (i32, i32, i32) {
    %c0_i32 = arith.constant 0 : i32
    %c0_i32_0 = arith.constant 0 : i32
    %c0_i32_1 = arith.constant 0 : i32
    return %arg0, %c0_i32, %c0_i32_0 : i32, i32, i32
  }
  func.func @transform_3(%arg0: i32) -> (i32, i32, i32) {
    %c0_i32 = arith.constant 0 : i32
    %c0_i32_0 = arith.constant 0 : i32
    %c0_i32_1 = arith.constant 0 : i32
    return %arg0, %c0_i32, %c0_i32_0 : i32, i32, i32
  }
}

</mosaic_0001>

<bundles_post_ra>
// kernel: tpu_custom_call.1
= control target key start
LH: loop header
LB: loop body
LE: loop exit
PB: predicated region body
PF: predicated region fallthrough
CT: control target
= control target key end

     0   :  { %8 = vsyncpa [#allocation3], 0  ;;  %s769_s0 = inlined_call_operand.vmem [shape: f32[4,8], index: 0, kind: input, shape index: {}]   ;;  %s770_s1 = inlined_call_operand.vmem [shape: s32[4,1], index: 1, kind: input, shape index: {}]   ;;  %s771_s2 = inlined_call_operand.hbm [shape: f32[4,16,16], index: 2, kind: input, shape index: {}]   ;;  %s772_s3 = inlined_call_operand.hbm [shape: f32[1,8,128], index: 3, kind: output, shape index: {}]  }
   0x1   :  { %9 = vsyncpa [#allocation4], 0  ;;  %s672_s12 = smov [#allocation2]   ;;  %s624_s16 = scalar_lea.hbm %s771_s2, 1024 }
   0x2   :  { %s19_s13 = sshll.u32 %s672_s12, 4  ;;  %p625_p0 = scmp.ne.s32.totalorder %s771_s2, %s624_s16  ;;  %s20_s13 = int_to_ptr.vmem [resolvable:$true] %s19_s13 }
   0x3   :  { %p628_p1 = scmp.lt.u32.totalorder %s624_s16, %s771_s2 }
   0x5   :  { %p630_p2 = pnand %p628_p1, %p625_p0 }
   0x7   :  { %633 = shalt.err (!%p630_p2)
}
   0x8   :  { %s634_s21 = scalar_lea.vmem %s20_s13, 1024  ;;  %p639_p4 = scmp.lt.s32.totalorder %s20_s13, %s20_s13 }
   0x9   :  { %p635_p3 = scmp.ne.s32.totalorder %s20_s13, %s634_s21  ;;  %p640_p5 = scmp.lt.s32.totalorder %s634_s21, %s634_s21 }
   0xb   :  { %p641_p6 = por %p640_p5, %p639_p4 }
   0xd   :  { %p642_p7 = pnand %p641_p6, %p635_p3 }
   0xf   :  { %645 = shalt.err (!%p642_p7)
}
  0x10   :  { %s673_s22 = smov 128   ;;  %s674_s23 = smov 8  }
  0x11   :  { %25 = dma.hbm_to_vmem [thread:$0]  %s771_s2, 1024, %s20_s13, [#allocation3], %s673_s22, %s673_s22, %s674_s23  }
  0x12   :  { %668 = dma.done.wait [#allocation3], 1024  }
  0x13   :  { %669 = vsyncadd [#allocation3], 4294966272  ;;  %vm43_vm0 = vcmask 130048   ;;  %v35_v1 = vld [vmem:[#allocation2] sm:$0xff]  ;;  %v36_v2 = vld [vmem:[#allocation2 + $0x8] sm:$0xff]  ;;  %v675_v46 = vmov 0   ;;  %v29_v47 = vlaneseq }
  0x14   :  { %vm711_vm1 = vmpackc.low %vm43_vm0, %vm43_vm0  ;;  %v37_v3 = vld [vmem:[#allocation2 + $0x10] sm:$0xff]  ;;  %v587_v4 = vpack.c.bf16 %v36_v2, %v35_v1  ;;  %v38_v5 = vld [vmem:[#allocation2 + $0x18] sm:$0xff]  ;;  %563 = vmatprep.mubr.msk.f32.mxu0 %vm43_vm0, %v35_v1  ;;  %620 = vset.pattern.permute.xlu1 %v675_v46  ;;  %vm427_vm2 = vcmask 130112   ;;  %vm456_vm3 = vcmask 1041409   ;;  %vm458_vm4 = vcmask 1042434   ;;  %s676_s4 = smov [#allocation5]  }
  0x15   :  { %570 = vmatprep.mubr.msk.f32.mxu1 %vm43_vm0, %v37_v3  ;;  %v39_v6 = vld [vmem:[#allocation2 + $0x20] sm:$0xff]  ;;  %v40_v7 = vld [vmem:[#allocation2 + $0x28] sm:$0xff]  ;;  %v593_v8 = vpack.c.bf16 %v38_v5, %v37_v3  ;;  %v41_v10 = vld [vmem:[#allocation2 + $0x30] sm:$0xff]  ;;  %621 = vset.pattern.permute.xlu0 %v675_v46  ;;  %v417_v48 = vand.u32 127, %v29_v47  ;;  %v30_v51 = vshrl.u32 %v29_v47, 7  ;;  %vm460_vm5 = vcmask 1043459  }
  0x16   :  { %v599_v9 = vpack.c.bf16 %v40_v7, %v39_v6  ;;  %v42_v11 = vld [vmem:[#allocation2 + $0x38] sm:$0xff]  ;;  %589 = vmatprep.subr.msk.bf16.mxu0 %vm711_vm1, %v587_v4  ;;  %v487_v45 = vld [vmem:[%s770_s1] sm:$0xf]  ;;  %vm463_vm6 = vcmask 125952   ;;  %vm475_vm12 = vcmask 3072   ;;  %vm496_vm13 = vcmask 60416  }
  0x17   :  { %v605_v12 = vpack.c.bf16 %v42_v11, %v41_v10  ;;  %595 = vmatprep.subr.msk.bf16.mxu1 %vm711_vm1, %v593_v8  ;;  %592 = vmatpush3.bf16.xpose.msk.msra.mxu0 %vm711_vm1, %v587_v4  ;;  %v422_v52 = vadd.s32 4294967288, %v417_v48  ;;  %v420_v53 = vsub.s32 %v417_v48, %v30_v51  ;;  %vm34_vm8 = vcmp.lt.s32.totalorder %v30_v51, 4  ;;  %s518_s5 = sshll.u32 %s676_s4, 4  ;;  %s519_s5 = int_to_ptr.vmem [resolvable:$true] %s518_s5 }
  0x18   :  { %598 = vmatpush3.bf16.xpose.msk.msra.mxu1 %vm711_vm1, %v593_v8  ;;  %601 = vmatprep.subr.msk.bf16.mxu0 %vm711_vm1, %v599_v9  ;;  %s646_s7 = scalar_lea.vmem %s519_s5, 128  ;;  %p651_p9 = scmp.lt.s32.totalorder %s519_s5, %s519_s5 }
  0x19   :  { %607 = vmatprep.subr.msk.bf16.mxu1 %vm711_vm1, %v605_v12  ;;  %v425_v56 = vsub.s32 %v422_v52, %v30_v51  ;;  %p647_p8 = scmp.ne.s32.totalorder %s519_s5, %s646_s7  ;;  %p652_p10 = scmp.lt.s32.totalorder %s646_s7, %s646_s7 }
  0x1b   :  { %p653_p11 = por %p652_p10, %p651_p9 }
  0x1d   :  { %p654_p12 = pnand %p653_p11, %p647_p8 }
  0x1e   :  { %564 = vmatmul.mubr.msk.f32.vlgmr.msra.gmra.mrb[0].mxu0 %vm43_vm0, %v36_v2 }
  0x1f   :  { %571 = vmatmul.mubr.msk.f32.vlgmr.msra.gmra.mrb[0].mxu1 %vm43_vm0, %v38_v5  ;;  %604 = vmatpush3.bf16.xpose.msk.msra.mxu0 %vm711_vm1, %v599_v9 }
  0x20   :  { %610 = vmatpush3.bf16.xpose.msk.msra.mxu1 %vm711_vm1, %v605_v12  ;;  %577 = vmatprep.mubr.msk.f32.mxu0 %vm43_vm0, %v39_v6 }
  0x21   :  { %584 = vmatprep.mubr.msk.f32.mxu1 %vm43_vm0, %v41_v10 }
  0x26   :  { %578 = vmatmul.mubr.msk.f32.vlgmr.msra.gmra.mrb[2].mxu0 %vm43_vm0, %v40_v7 }
  0x27   :  { %585 = vmatmul.mubr.msk.f32.vlgmr.msra.gmra.mrb[2].mxu1 %vm43_vm0, %v42_v11 }
  0xf1   :  { %v565_v13 = vpop.f32.mrb[0].mxu0 }
  0xf2   :  { %v369_v14 = vsub.f32 %v565_v13, %v36_v2  ;;  %v572_v15 = vpop.f32.mrb[0].mxu1  ;;  %v116_v16 = vpop.f32.mrb[1].mxu0 }
  0xf3   :  { %v371_v17 = vsub.f32 %v572_v15, %v38_v5  ;;  %v368_v18 = vsub.f32 %v116_v16, %v35_v1  ;;  %v197_v19 = vpop.f32.mrb[1].mxu1 }
  0xf4   :  { %v377_v20 = vmul.f32 %v369_v14, %v369_v14  ;;  %v370_v21 = vsub.f32 %v197_v19, %v37_v3 }
  0xf5   :  { %v379_v22 = vmul.f32 %v371_v17, %v371_v17  ;;  %v376_v23 = vmul.f32 %v368_v18, %v368_v18  ;;  %v486_v18 = vld [vmem:[%s769_s0] sm:$0xf] }
  0xf6   :  { %v387_v24 = vsel %vm43_vm0, %v377_v20, 0.0  ;;  %v378_v25 = vmul.f32 %v370_v21, %v370_v21 }
  0xf7   :  { %v393_v26 = vsel %vm43_vm0, %v379_v22, 0.0  ;;  %388 = vadd.xlane.f32.xlu0 %v387_v24  ;;  %v384_v30 = vsel %vm43_vm0, %v376_v23, 0.0 }
  0xf8   :  { %394 = vadd.xlane.f32.xlu1 %v393_v26  ;;  %v390_v33 = vsel %vm43_vm0, %v378_v25, 0.0 }
  0xf9   :  { %v579_v27 = vpop.f32.mrb[2].mxu0 }
  0xfa   :  { %v373_v28 = vsub.f32 %v579_v27, %v40_v7  ;;  %v278_v29 = vpop.f32.mrb[3].mxu0  ;;  %v586_v31 = vpop.f32.mrb[2].mxu1 }
  0xfb   :  { %v372_v32 = vsub.f32 %v278_v29, %v39_v6  ;;  %385 = vadd.xlane.f32.xlu0 %v384_v30  ;;  %v375_v34 = vsub.f32 %v586_v31, %v42_v11  ;;  %v359_v35 = vpop.f32.mrb[3].mxu1 }
  0xfc   :  { %v381_v36 = vmul.f32 %v373_v28, %v373_v28  ;;  %391 = vadd.xlane.f32.xlu1 %v390_v33  ;;  %v374_v37 = vsub.f32 %v359_v35, %v41_v10 }
  0xfd   :  { %v380_v38 = vmul.f32 %v372_v32, %v372_v32  ;;  %v383_v39 = vmul.f32 %v375_v34, %v375_v34 }
  0xfe   :  { %v382_v40 = vmul.f32 %v374_v37, %v374_v37  ;;  %v399_v41 = vsel %vm43_vm0, %v381_v36, 0.0 }
  0xff   :  { %v396_v42 = vsel %vm43_vm0, %v380_v38, 0.0  ;;  %v405_v43 = vsel %vm43_vm0, %v383_v39, 0.0 }
 0x100   :  { %400 = vadd.xlane.f32.xlu1 %v399_v41  ;;  %397 = vadd.xlane.f32.xlu0 %v396_v42  ;;  %v402_v44 = vsel %vm43_vm0, %v382_v40, 0.0 }
 0x104   :  { %406 = vadd.xlane.f32.xlu1 %v405_v43  ;;  %403 = vadd.xlane.f32.xlu0 %v402_v44 }
 0x115   :  { %489 = vperm.xlu1 %620, %v487_v45  }
 0x184   :  { %v389_v49 = vpop.xlane.xlu0 %388 }
 0x185   :  { %v395_v50 = vpop.xlane.xlu1 %394  ;;  %v426_v62 = vrot.slane %v389_v49, %v425_v56 }
 0x186   :  { %v436_v61 = vrot.slane %v395_v50, %v425_v56 }
 0x188   :  { %v386_v54 = vpop.xlane.xlu0 %385 }
 0x189   :  { %v392_v55 = vpop.xlane.xlu1 %391  ;;  %v421_v58 = vrot.slane %v386_v54, %v420_v53 }
 0x18a   :  { %v432_v57 = vrot.slane %v392_v55, %v420_v53 }
 0x18b   :  { %v428_v2 = vsel %vm427_vm2, %v426_v62, %v421_v58 }
 0x18c   :  { %v437_v1 = vsel %vm427_vm2, %v436_v61, %v432_v57 }
 0x18d   :  { %v401_v59 = vpop.xlane.xlu1 %400  ;;  %v398_v60 = vpop.xlane.xlu0 %397  ;;  %v457_v8 = vsel %vm456_vm3, %v437_v1, %v428_v2 }
 0x18e   :  { %v445_v63 = vrot.slane %v401_v59, %v425_v56  ;;  %v441_v0 = vrot.slane %v398_v60, %v420_v53 }
 0x190   :  { %v446_v3 = vsel %vm427_vm2, %v445_v63, %v441_v0 }
 0x191   :  { %v407_v4 = vpop.xlane.xlu1 %406  ;;  %v404_v5 = vpop.xlane.xlu0 %403  ;;  %v459_v10 = vsel %vm458_vm4, %v446_v3, %v457_v8 }
 0x192   :  { %v454_v6 = vrot.slane %v407_v4, %v425_v56  ;;  %v450_v7 = vrot.slane %v404_v5, %v420_v53 }
 0x194   :  { %v455_v9 = vsel %vm427_vm2, %v454_v6, %v450_v7 }
 0x195   :  { %v461_v11 = vsel %vm460_vm5, %v455_v9, %v459_v10  ;;  %v490_v14 = vpop.permute.xlu1 %489 }
 0x196   :  { %v464_v12 = vsel %vm463_vm6, %v461_v11, 0.0  ;;  %vm491_vm7 = vcmp.eq.s32.totalorder %v417_v48, %v490_v14 }
 0x197   :  { %465 = vadd.xlane.f32.xlu0 %v464_v12  ;;  %vm494_vm9 = vmand %vm34_vm8, %vm491_vm7 }
 0x198   :  { %v495_v22 = vsel %vm494_vm9, %v486_v18, 0.0 }
 0x199   :  { %v497_v24 = vsel %vm496_vm13, %v495_v22, 0.0 }
 0x224   :  { %v466_v13 = vpop.xlane.xlu0 %465 }
 0x225   :  { %622 = vrsqrt.f32 %v466_v13  ;;  %vm469_vm10 = vcmp.eq.f32.partialorder %v466_v13, inf  ;;  %v472_v17 = vand.u32 2147483648, %v466_v13  ;;  %vm471_vm11 = vcmp.eq.f32.partialorder %v466_v13, 0.0 }
 0x22f   :  { %v623_v15 = vpop.eup %622 }
 0x230   :  { %v468_v16 = vmul.f32 %v623_v15, %v466_v13 }
 0x232   :  { %v470_v19 = vsel %vm469_vm10, %v466_v13, %v468_v16 }
 0x233   :  { %v473_v20 = vsel %vm471_vm11, %v472_v17, %v470_v19 }
 0x234   :  { %v474_v21 = vsel %vm34_vm8, %v473_v20, 0.0 }
 0x235   :  { %v476_v23 = vsel %vm475_vm12, %v474_v21, 0.0 }
 0x236   :  { %477 = vadd.xlane.f32.xlu0 %v476_v23 }
 0x23a   :  { %498 = vadd.xlane.f32.xlu0 %v497_v24 }
 0x2c3   :  { %v478_v25 = vpop.xlane.xlu0 %477 }
 0x2c4   :  { %v479_v26 = vrot.slane %v478_v25, 4 }
 0x2c6   :  { %v480_v27 = vadd.f32 %v479_v26, %v478_v25 }
 0x2c7   :  { %v499_v28 = vpop.xlane.xlu0 %498 }
 0x2c8   :  { %v481_v29 = vrot.slane %v480_v27, 2  ;;  %v500_v30 = vrot.slane %v499_v28, 4 }
 0x2ca   :  { %v501_v31 = vadd.f32 %v500_v30, %v499_v28  ;;  %v482_v32 = vadd.f32 %v481_v29, %v480_v27 }
 0x2cc   :  { %v502_v33 = vrot.slane %v501_v31, 2  ;;  %v483_v34 = vrot.slane %v482_v32, 1 }
 0x2ce   :  { %v503_v35 = vadd.f32 %v502_v33, %v501_v31  ;;  %v484_v36 = vadd.f32 %v483_v34, %v482_v32 }
 0x2d0   :  { %611 = vpush %v484_v36  ;;  %v504_v37 = vrot.slane %v503_v35, 1 }
 0x2d2   :  { %v505_v38 = vadd.f32 %v504_v37, %v503_v35 }
 0x2d4   :  { %613 = vpush %v505_v38 }
 0x301   :  { %s612_s0 = spop %611 }
 0x302   :  { %s507_s28 = smul.f32 0.00025, %s612_s0 }
 0x305   :  { %s614_s29 = spop %613 }
 0x306   :  { %s508_s30 = smul.f32 0.25, %s614_s29 }
 0x308   :  { %s509_s6 = ssub.f32 %s507_s28, %s508_s30 }
 0x30a   :  { %v510_v39 = vstv %s509_s6 }
 0x30b   :  { %511 = vst [vmem:[#allocation5] sm:$0xff] %v510_v39 }
 0x30c   :  { %657 = shalt.err (!%p654_p12)
}
 0x30d   :  { %s658_s10 = scalar_lea.hbm %s772_s3, 128 }
 0x30e   :  { %p659_p13 = scmp.ne.s32.totalorder %s772_s3, %s658_s10  ;;  %p662_p0 = scmp.lt.u32.totalorder %s658_s10, %s772_s3 }
 0x310   :  { %p664_p1 = pnand %p662_p0, %p659_p13 }
 0x312   :  { %667 = shalt.err (!%p664_p1)
}
 0x313   :  { %521 = dma.vmem_to_hbm [thread:$0]  %s519_s5, 128, %s772_s3, [#allocation4]  }
 0x314   :  { %670 = dma.done.wait [#allocation4], 128  }
 0x315   :  { %671 = vsyncadd [#allocation4], 4294967168 }
 0x316   :  { %525 = vsyncpa [#allocation3], 1 }
 0x317   :  { %526 = vsyncpa [#allocation4], 1 }

</bundles_post_ra>
